<compile_context>
chip_gen: v5e
topology: v5e:2x2
jax: 0.10.0
libtpu: 0.0.40
codegen_flags: <defaults>
</compile_context>

<pallas_src>
import functools

import jax
import jax.numpy as jnp
from jax.experimental import pallas as pl
from jax.experimental.pallas import tpu as pltpu

LANE = 128
SUB = 8
VMEM_LIMIT = 32 * 1024 * 1024       # safe on v5e/v6e (128 MiB) and v7x (64 MiB)
FUSED_MAX_NODES = 1024              # padded-N cutoff for the fully-fused path


def _round_up(x, m):
    return ((x + m - 1) // m) * m


def _pad2d(arr, rows, cols, dtype):
    out = jnp.zeros((rows, cols), dtype)
    r, c = arr.shape
    return out.at[:r, :c].set(arr.astype(dtype))


# --------------------------------------------------------------------------
# Fully-fused kernel (small graphs): whole forward in one pallas_call
# --------------------------------------------------------------------------
def _fused_gcn_kernel(x_ref, a_ref, p_ref,
                      w1_ref, s1_ref, t1_ref,
                      w2_ref, s2_ref, t2_ref,
                      w3_ref, b3_ref, o_ref, *, slope):
    a = a_ref[...]                                                  # bf16 (N, N)

    # ---- layer 1: LeakyReLU((A @ (X @ W1)) * s1 + t1) ----
    xw = jnp.dot(x_ref[...], w1_ref[...],
                 preferred_element_type=jnp.float32)
    h = jnp.dot(a, xw.astype(jnp.bfloat16),
                preferred_element_type=jnp.float32)
    h = h * s1_ref[...] + t1_ref[...]                               # folded BN (+bias)
    h = jnp.where(h >= 0, h, slope * h).astype(jnp.bfloat16)        # LeakyReLU(0.1)

    # ---- layer 2 ----
    xw2 = jnp.dot(h, w2_ref[...], preferred_element_type=jnp.float32)
    h2 = jnp.dot(a, xw2.astype(jnp.bfloat16),
                 preferred_element_type=jnp.float32)
    h2 = h2 * s2_ref[...] + t2_ref[...]
    h2 = jnp.where(h2 >= 0, h2, slope * h2).astype(jnp.bfloat16)

    # ---- global mean pool + linear head ----
    g = jnp.dot(p_ref[...], h2, preferred_element_type=jnp.float32)
    o_ref[...] = (
        jnp.dot(g.astype(jnp.bfloat16), w3_ref[...],
                preferred_element_type=jnp.float32)
        + b3_ref[...]
    ).astype(o_ref.dtype)


def _fused_forward(x_p, a_p, pool_p, w1, s1, t1, w2, s2, t2, w3, b3):
    n_pad, f_in = x_p.shape
    g_p = pool_p.shape[0]
    h1 = w1.shape[1]
    h2 = w2.shape[1]
    c = w3.shape[1]

    def spec(arr):
        return pl.BlockSpec(arr.shape, lambda i: (0, 0))

    flops = (2 * n_pad * f_in * h1 + 2 * n_pad * n_pad * h1
             + 2 * n_pad * h1 * h2 + 2 * n_pad * n_pad * h2
             + 2 * g_p * n_pad * h2 + 2 * g_p * h2 * c)
    bytes_acc = 2 * (n_pad * f_in + n_pad * n_pad + g_p * n_pad
                     + f_in * h1 + h1 * h2 + h2 * c) \
        + 4 * (2 * h1 + 2 * h2 + c + g_p * c)

    kern = functools.partial(_fused_gcn_kernel, slope=0.1)
    return pl.pallas_call(
        kern,
        out_shape=jax.ShapeDtypeStruct((g_p, c), jnp.float32),
        grid_spec=pltpu.PrefetchScalarGridSpec(
            num_scalar_prefetch=0,
            grid=(1,),
            in_specs=[spec(x_p), spec(a_p), spec(pool_p),
                      spec(w1), spec(s1), spec(t1),
                      spec(w2), spec(s2), spec(t2),
                      spec(w3), spec(b3)],
            out_specs=pl.BlockSpec((g_p, c), lambda i: (0, 0)),
        ),
        compiler_params=pltpu.CompilerParams(
            dimension_semantics=("arbitrary",),
            vmem_limit_bytes=VMEM_LIMIT,
        ),
        cost_estimate=pl.CostEstimate(
            flops=flops, transcendentals=0, bytes_accessed=bytes_acc),
    )(x_p, a_p, pool_p, w1, s1, t1, w2, s2, t2, w3, b3)


# --------------------------------------------------------------------------
# Tiled kernels (large graphs)
# --------------------------------------------------------------------------
def _xw_kernel(x_ref, w_ref, o_ref):
    # XW = X @ W  (bf16 in, f32 accumulate, bf16 out)
    o_ref[...] = jnp.dot(
        x_ref[...], w_ref[...], preferred_element_type=jnp.float32
    ).astype(o_ref.dtype)


def _agg_bn_lrelu_kernel(a_ref, xw_ref, s_ref, t_ref, o_ref, acc_ref, *, slope):
    # H = LeakyReLU((A_hat @ XW) * s + t), tiled reduction over A_hat columns.
    k = pl.program_id(1)

    @pl.when(k == 0)
    def _():
        acc_ref[...] = jnp.zeros_like(acc_ref)

    acc_ref[...] += jnp.dot(
        a_ref[...], xw_ref[...], preferred_element_type=jnp.float32
    )

    @pl.when(k == pl.num_programs(1) - 1)
    def _():
        h = acc_ref[...] * s_ref[...] + t_ref[...]   # folded BN (+ GCN bias)
        h = jnp.where(h >= 0, h, slope * h)          # LeakyReLU(0.1)
        o_ref[...] = h.astype(o_ref.dtype)


def _pool_head_kernel(p_ref, h_ref, w_ref, b_ref, o_ref, acc_ref):
    # out = (P @ H) @ W3 + b3, tiled reduction over the node axis.
    k = pl.program_id(0)

    @pl.when(k == 0)
    def _():
        acc_ref[...] = jnp.zeros_like(acc_ref)

    acc_ref[...] += jnp.dot(
        p_ref[...], h_ref[...], preferred_element_type=jnp.float32
    )

    @pl.when(k == pl.num_programs(0) - 1)
    def _():
        o_ref[...] = (
            jnp.dot(acc_ref[...].astype(jnp.bfloat16), w_ref[...],
                    preferred_element_type=jnp.float32)
            + b_ref[...]
        ).astype(o_ref.dtype)


def _gcn_layer(x_p, a_p, w_p, s_p, t_p, *, tm, tk, slope=0.1):
    """One GCN layer on padded inputs: LeakyReLU((A @ (X @ W)) * s + t)."""
    n_pad = a_p.shape[0]
    f_in = x_p.shape[1]
    f_out = w_p.shape[1]
    n_i = n_pad // tm
    n_k = n_pad // tk

    # Stage 1: XW = X @ W (row-tiled, weight resident)
    xw = pl.pallas_call(
        _xw_kernel,
        out_shape=jax.ShapeDtypeStruct((n_pad, f_out), jnp.bfloat16),
        grid_spec=pltpu.PrefetchScalarGridSpec(
            num_scalar_prefetch=0,
            grid=(n_i,),
            in_specs=[
                pl.BlockSpec((tm, f_in), lambda i: (i, 0)),
                pl.BlockSpec((f_in, f_out), lambda i: (0, 0)),
            ],
            out_specs=pl.BlockSpec((tm, f_out), lambda i: (i, 0)),
        ),
        compiler_params=pltpu.CompilerParams(
            dimension_semantics=("parallel",),
            vmem_limit_bytes=VMEM_LIMIT,
        ),
        cost_estimate=pl.CostEstimate(
            flops=2 * n_pad * f_in * f_out,
            transcendentals=0,
            bytes_accessed=2 * (n_pad * f_in + f_in * f_out + n_pad * f_out),
        ),
    )(x_p, w_p)

    # Stage 2: A_hat aggregation + folded-BN + LeakyReLU epilogue
    kern = functools.partial(_agg_bn_lrelu_kernel, slope=slope)
    h = pl.pallas_call(
        kern,
        out_shape=jax.ShapeDtypeStruct((n_pad, f_out), jnp.bfloat16),
        grid_spec=pltpu.PrefetchScalarGridSpec(
            num_scalar_prefetch=0,
            grid=(n_i, n_k),
            in_specs=[
                pl.BlockSpec((tm, tk), lambda i, k: (i, k)),       # A_hat tile
                pl.BlockSpec((tk, f_out), lambda i, k: (k, 0)),    # XW tile
                pl.BlockSpec((1, f_out), lambda i, k: (0, 0)),     # scale (resident)
                pl.BlockSpec((1, f_out), lambda i, k: (0, 0)),     # shift (resident)
            ],
            out_specs=pl.BlockSpec((tm, f_out), lambda i, k: (i, 0)),
            scratch_shapes=[pltpu.VMEM((tm, f_out), jnp.float32)],
        ),
        compiler_params=pltpu.CompilerParams(
            dimension_semantics=("parallel", "arbitrary"),
            vmem_limit_bytes=VMEM_LIMIT,
        ),
        cost_estimate=pl.CostEstimate(
            flops=2 * n_pad * n_pad * f_out + 4 * n_pad * f_out,
            transcendentals=0,
            bytes_accessed=2 * (n_pad * n_pad + 2 * n_pad * f_out) + 8 * f_out,
        ),
    )(a_p, xw, s_p, t_p)
    return h


def _pool_head(pool_p, h_p, w3_p, b3_p, *, tk):
    """(P @ H) @ W3 + b3 on padded inputs, reduction over node tiles."""
    g_pad, n_pad = pool_p.shape
    f = h_p.shape[1]
    c = w3_p.shape[1]
    n_k = n_pad // tk

    return pl.pallas_call(
        _pool_head_kernel,
        out_shape=jax.ShapeDtypeStruct((g_pad, c), jnp.float32),
        grid_spec=pltpu.PrefetchScalarGridSpec(
            num_scalar_prefetch=0,
            grid=(n_k,),
            in_specs=[
                pl.BlockSpec((g_pad, tk), lambda k: (0, k)),   # pool tile
                pl.BlockSpec((tk, f), lambda k: (k, 0)),       # H tile
                pl.BlockSpec((f, c), lambda k: (0, 0)),        # W3 (resident)
                pl.BlockSpec((1, c), lambda k: (0, 0)),        # b3 (resident)
            ],
            out_specs=pl.BlockSpec((g_pad, c), lambda k: (0, 0)),
            scratch_shapes=[pltpu.VMEM((g_pad, f), jnp.float32)],
        ),
        compiler_params=pltpu.CompilerParams(
            dimension_semantics=("arbitrary",),
            vmem_limit_bytes=VMEM_LIMIT,
        ),
        cost_estimate=pl.CostEstimate(
            flops=2 * g_pad * n_pad * f + 2 * g_pad * f * c,
            transcendentals=0,
            bytes_accessed=2 * (g_pad * n_pad + n_pad * f + f * c) + 4 * g_pad * c,
        ),
    )(pool_p, h_p, w3_p, b3_p)


# --------------------------------------------------------------------------
# Full forward: pad / cast, pick fused vs. tiled path
# --------------------------------------------------------------------------
def gcn_forward(x, a_hat, pool, folded_params, num_classes):
    (w1, s1, t1, w2, s2, t2, w3, b3) = folded_params
    n, f_in = x.shape
    g = pool.shape[0]
    h1_dim = w1.shape[1]
    h2_dim = w2.shape[1]
    c_dim = w3.shape[1]

    f_in_p = _round_up(f_in, LANE)
    h1_p = _round_up(h1_dim, LANE)
    h2_p = _round_up(h2_dim, LANE)
    c_p = _round_up(c_dim, LANE)
    g_p = _round_up(g, SUB)

    n_pad_small = _round_up(max(n, SUB), LANE)
    use_fused = n_pad_small <= FUSED_MAX_NODES

    if use_fused:
        n_pad = n_pad_small
    else:
        tm = min(256, _round_up(n, LANE))
        tk = tm
        n_pad = _round_up(n, tm)

    # Lane-dense, bf16 MXU operands; f32 epilogue params.
    x_p = _pad2d(x, n_pad, f_in_p, jnp.bfloat16)
    a_p = _pad2d(a_hat, n_pad, n_pad, jnp.bfloat16)
    pool_p = _pad2d(pool, g_p, n_pad, jnp.bfloat16)
    w1_p = _pad2d(w1, f_in_p, h1_p, jnp.bfloat16)
    w2_p = _pad2d(w2, h1_p, h2_p, jnp.bfloat16)
    w3_p = _pad2d(w3, h2_p, c_p, jnp.bfloat16)
    s1_p = _pad2d(s1, 1, h1_p, jnp.float32)
    t1_p = _pad2d(t1, 1, h1_p, jnp.float32)
    s2_p = _pad2d(s2, 1, h2_p, jnp.float32)
    t2_p = _pad2d(t2, 1, h2_p, jnp.float32)
    b3_p = _pad2d(b3, 1, c_p, jnp.float32)

    if use_fused:
        out = _fused_forward(x_p, a_p, pool_p,
                             w1_p, s1_p, t1_p,
                             w2_p, s2_p, t2_p,
                             w3_p, b3_p)
    else:
        h1 = _gcn_layer(x_p, a_p, w1_p, s1_p, t1_p, tm=tm, tk=tk)
        h2 = _gcn_layer(h1, a_p, w2_p, s2_p, t2_p, tm=tm, tk=tk)
        out = _pool_head(pool_p, h2, w3_p, b3_p, tk=tk)
    return out[:g, :num_classes]


# --------------------------------------------------------------------------
# Graph / parameter setup and pure-JAX reference
# --------------------------------------------------------------------------
def build_graph_mats(edge_index, batch, num_nodes, num_graphs):
    # Dense normalized adjacency: A_hat = D^-1/2 (A + I) D^-1/2
    src, dst = edge_index
    A = jnp.zeros((num_nodes, num_nodes), jnp.float32)
    A = A.at[src, dst].add(1.0)          # sum duplicate edges (PyG gcn_norm)
    A = A + jnp.eye(num_nodes, dtype=jnp.float32)
    deg = A.sum(axis=1)
    dinv = 1.0 / jnp.sqrt(deg)
    a_hat = dinv[:, None] * A * dinv[None, :]

    # Mean-pool matrix: P[g, n] = (batch[n] == g) / count_g
    onehot = (batch[None, :] == jnp.arange(num_graphs)[:, None]).astype(jnp.float32)
    counts = jnp.maximum(onehot.sum(axis=1, keepdims=True), 1.0)
    pool = onehot / counts
    return a_hat, pool


def init_params(key, input_dim, hidden_dim, output_dim, num_classes):
    ks = jax.random.split(key, 10)

    def glorot(k, shape):
        fan_in, fan_out = shape
        lim = (6.0 / (fan_in + fan_out)) ** 0.5
        return jax.random.uniform(k, shape, jnp.float32, -lim, lim)

    p = {}
    p["w1"] = glorot(ks[0], (input_dim, hidden_dim))
    p["b1"] = jnp.zeros((1, hidden_dim), jnp.float32)
    p["w2"] = glorot(ks[1], (hidden_dim, output_dim))
    p["b2"] = jnp.zeros((1, output_dim), jnp.float32)

    # BatchNorm1d (eval mode) affine params + running stats
    p["g1"] = 1.0 + 0.1 * jax.random.normal(ks[2], (hidden_dim,), jnp.float32)
    p["be1"] = 0.1 * jax.random.normal(ks[3], (hidden_dim,), jnp.float32)
    p["rm1"] = 0.05 * jax.random.normal(ks[4], (hidden_dim,), jnp.float32)
    p["rv1"] = jnp.ones((hidden_dim,), jnp.float32)
    p["g2"] = 1.0 + 0.1 * jax.random.normal(ks[5], (output_dim,), jnp.float32)
    p["be2"] = 0.1 * jax.random.normal(ks[6], (output_dim,), jnp.float32)
    p["rm2"] = 0.05 * jax.random.normal(ks[7], (output_dim,), jnp.float32)
    p["rv2"] = jnp.ones((output_dim,), jnp.float32)

    # linear2 (output head); linear1 is unused in forward() and omitted.
    lim3 = 1.0 / (output_dim ** 0.5)
    p["w3"] = jax.random.uniform(ks[8], (output_dim, num_classes), jnp.float32,
                                 -lim3, lim3)
    p["b3"] = jax.random.uniform(ks[9], (1, num_classes), jnp.float32,
                                 -lim3, lim3)
    return p


def fold_params(p, eps=1e-5):
    """Fold eval-mode BN to scale/shift and the GCNConv bias into the shift."""
    s1 = (p["g1"] / jnp.sqrt(p["rv1"] + eps)).reshape(1, -1)
    t1 = (p["be1"] - p["rm1"] * p["g1"] / jnp.sqrt(p["rv1"] + eps)).reshape(1, -1)
    t1 = p["b1"] * s1 + t1
    s2 = (p["g2"] / jnp.sqrt(p["rv2"] + eps)).reshape(1, -1)
    t2 = (p["be2"] - p["rm2"] * p["g2"] / jnp.sqrt(p["rv2"] + eps)).reshape(1, -1)
    t2 = p["b2"] * s2 + t2
    return (p["w1"], s1, t1, p["w2"], s2, t2, p["w3"], p["b3"])


def reference_forward(x, a_hat, pool, p, eps=1e-5):
    h = a_hat @ (x @ p["w1"]) + p["b1"]
    h = (h - p["rm1"]) / jnp.sqrt(p["rv1"] + eps) * p["g1"] + p["be1"]
    h = jnp.where(h >= 0, h, 0.1 * h)
    h = a_hat @ (h @ p["w2"]) + p["b2"]
    h = (h - p["rm2"]) / jnp.sqrt(p["rv2"] + eps) * p["g2"] + p["be2"]
    h = jnp.where(h >= 0, h, 0.1 * h)
    g = pool @ h
    return g @ p["w3"] + p["b3"]


# --------------------------------------------------------------------------
if __name__ == "__main__":
    input_dim, hidden_dim, output_dim, num_classes = 4, 32, 32, 3
    num_nodes, num_graphs = 8, 2

    key = jax.random.PRNGKey(0)
    k_x, k_p = jax.random.split(key)

    # Node features [N, F]
    x = jax.random.normal(k_x, (num_nodes, input_dim), jnp.float32)

    # Two small graphs of 4 nodes each (undirected ring within each graph).
    src = jnp.array([0, 1, 1, 2, 2, 3, 3, 0, 4, 5, 5, 6, 6, 7, 7, 4],
                    dtype=jnp.int32)
    dst = jnp.array([1, 0, 2, 1, 3, 2, 0, 3, 5, 4, 6, 5, 7, 6, 4, 7],
                    dtype=jnp.int32)
    batch = jnp.array([0, 0, 0, 0, 1, 1, 1, 1], dtype=jnp.int32)

    a_hat, pool = build_graph_mats((src, dst), batch, num_nodes, num_graphs)
    params = init_params(k_p, input_dim, hidden_dim, output_dim, num_classes)
    folded = fold_params(params)

    out = gcn_forward(x, a_hat, pool, folded, num_classes)
    out = jax.block_until_ready(out)

    ref = reference_forward(x, a_hat, pool, params)
    assert out.shape == (num_graphs, num_classes)
    # bf16 MXU path vs. f32 reference -> loose tolerance
    assert jnp.allclose(out, ref, atol=5e-2, rtol=5e-2), (out, ref)
    print("KERNEL_OK")
</pallas_src>

<mosaic_0001>
module attributes {stable_mosaic.version = 11 : i64} {
  func.func @_fused_gcn_kernel(%arg0: i32, %arg1: memref<128x128xbf16, #tpu.memory_space<vmem>>, %arg2: memref<128x128xbf16, #tpu.memory_space<vmem>>, %arg3: memref<8x128xbf16, #tpu.memory_space<vmem>>, %arg4: memref<128x128xbf16, #tpu.memory_space<vmem>>, %arg5: memref<1x128xf32, #tpu.memory_space<vmem>>, %arg6: memref<1x128xf32, #tpu.memory_space<vmem>>, %arg7: memref<128x128xbf16, #tpu.memory_space<vmem>>, %arg8: memref<1x128xf32, #tpu.memory_space<vmem>>, %arg9: memref<1x128xf32, #tpu.memory_space<vmem>>, %arg10: memref<128x128xbf16, #tpu.memory_space<vmem>>, %arg11: memref<1x128xf32, #tpu.memory_space<vmem>>, %arg12: memref<8x128xf32, #tpu.memory_space<vmem>>) attributes {dimension_semantics = [#tpu.dimension_semantics<arbitrary>], iteration_bounds = array<i64: 1>, scalar_prefetch = 0 : i64, scratch_operands = 0 : i64, tpu.core_type = #tpu.core_type<tc>, window_params = [{pipeline_mode = #tpu.pipeline_mode<synchronous>, transform_indices = @transform_0, window_bounds = array<i64: 128, 128>}, {pipeline_mode = #tpu.pipeline_mode<synchronous>, transform_indices = @transform_1, window_bounds = array<i64: 128, 128>}, {pipeline_mode = #tpu.pipeline_mode<synchronous>, transform_indices = @transform_2, window_bounds = array<i64: 8, 128>}, {pipeline_mode = #tpu.pipeline_mode<synchronous>, transform_indices = @transform_3, window_bounds = array<i64: 128, 128>}, {pipeline_mode = #tpu.pipeline_mode<synchronous>, transform_indices = @transform_4, window_bounds = array<i64: 1, 128>}, {pipeline_mode = #tpu.pipeline_mode<synchronous>, transform_indices = @transform_5, window_bounds = array<i64: 1, 128>}, {pipeline_mode = #tpu.pipeline_mode<synchronous>, transform_indices = @transform_6, window_bounds = array<i64: 128, 128>}, {pipeline_mode = #tpu.pipeline_mode<synchronous>, transform_indices = @transform_7, window_bounds = array<i64: 1, 128>}, {pipeline_mode = #tpu.pipeline_mode<synchronous>, transform_indices = @transform_8, window_bounds = array<i64: 1, 128>}, {pipeline_mode = #tpu.pipeline_mode<synchronous>, transform_indices = @transform_9, window_bounds = array<i64: 128, 128>}, {pipeline_mode = #tpu.pipeline_mode<synchronous>, transform_indices = @transform_10, window_bounds = array<i64: 1, 128>}, {pipeline_mode = #tpu.pipeline_mode<synchronous>, transform_indices = @transform_11, window_bounds = array<i64: 8, 128>}]} {
    %c0 = arith.constant 0 : index
    %c0_0 = arith.constant 0 : index
    %0 = vector.load %arg2[%c0, %c0_0] : memref<128x128xbf16, #tpu.memory_space<vmem>>, vector<128x128xbf16>
    %c0_1 = arith.constant 0 : index
    %c0_2 = arith.constant 0 : index
    %1 = vector.load %arg1[%c0_1, %c0_2] : memref<128x128xbf16, #tpu.memory_space<vmem>>, vector<128x128xbf16>
    %c0_3 = arith.constant 0 : index
    %c0_4 = arith.constant 0 : index
    %2 = vector.load %arg4[%c0_3, %c0_4] : memref<128x128xbf16, #tpu.memory_space<vmem>>, vector<128x128xbf16>
    %cst = arith.constant dense<0.000000e+00> : vector<128x128xf32>
    %3 = tpu.matmul %1, %2, %cst {dimension_numbers = #tpu.dot_dimension_numbers<[1], [0], [0], [1], [0, 0, 1, 1], [], []>} : vector<128x128xbf16>, vector<128x128xbf16>, vector<128x128xf32> -> vector<128x128xf32>
    %4 = arith.truncf %3 : vector<128x128xf32> to vector<128x128xbf16>
    %cst_5 = arith.constant dense<0.000000e+00> : vector<128x128xf32>
    %5 = tpu.matmul %0, %4, %cst_5 {dimension_numbers = #tpu.dot_dimension_numbers<[1], [0], [0], [1], [0, 0, 1, 1], [], []>} : vector<128x128xbf16>, vector<128x128xbf16>, vector<128x128xf32> -> vector<128x128xf32>
    %c0_6 = arith.constant 0 : index
    %c0_7 = arith.constant 0 : index
    %6 = vector.load %arg5[%c0_6, %c0_7] : memref<1x128xf32, #tpu.memory_space<vmem>>, vector<1x128xf32>
    %7 = vector.broadcast %6 : vector<1x128xf32> to vector<128x128xf32>
    %8 = arith.mulf %5, %7 : vector<128x128xf32>
    %c0_8 = arith.constant 0 : index
    %c0_9 = arith.constant 0 : index
    %9 = vector.load %arg6[%c0_8, %c0_9] : memref<1x128xf32, #tpu.memory_space<vmem>>, vector<1x128xf32>
    %10 = vector.broadcast %9 : vector<1x128xf32> to vector<128x128xf32>
    %11 = arith.addf %8, %10 : vector<128x128xf32>
    %cst_10 = arith.constant 0.000000e+00 : f32
    %12 = vector.broadcast %cst_10 : f32 to vector<128x128xf32>
    %13 = arith.cmpf oge, %11, %12 : vector<128x128xf32>
    %cst_11 = arith.constant 1.000000e-01 : f32
    %14 = vector.broadcast %cst_11 : f32 to vector<128x128xf32>
    %15 = arith.mulf %14, %11 : vector<128x128xf32>
    %16 = arith.select %13, %11, %15 : vector<128x128xi1>, vector<128x128xf32>
    %17 = arith.truncf %16 : vector<128x128xf32> to vector<128x128xbf16>
    %c0_12 = arith.constant 0 : index
    %c0_13 = arith.constant 0 : index
    %18 = vector.load %arg7[%c0_12, %c0_13] : memref<128x128xbf16, #tpu.memory_space<vmem>>, vector<128x128xbf16>
    %cst_14 = arith.constant dense<0.000000e+00> : vector<128x128xf32>
    %19 = tpu.matmul %17, %18, %cst_14 {dimension_numbers = #tpu.dot_dimension_numbers<[1], [0], [0], [1], [0, 0, 1, 1], [], []>} : vector<128x128xbf16>, vector<128x128xbf16>, vector<128x128xf32> -> vector<128x128xf32>
    %20 = arith.truncf %19 : vector<128x128xf32> to vector<128x128xbf16>
    %cst_15 = arith.constant dense<0.000000e+00> : vector<128x128xf32>
    %21 = tpu.matmul %0, %20, %cst_15 {dimension_numbers = #tpu.dot_dimension_numbers<[1], [0], [0], [1], [0, 0, 1, 1], [], []>} : vector<128x128xbf16>, vector<128x128xbf16>, vector<128x128xf32> -> vector<128x128xf32>
    %c0_16 = arith.constant 0 : index
    %c0_17 = arith.constant 0 : index
    %22 = vector.load %arg8[%c0_16, %c0_17] : memref<1x128xf32, #tpu.memory_space<vmem>>, vector<1x128xf32>
    %23 = vector.broadcast %22 : vector<1x128xf32> to vector<128x128xf32>
    %24 = arith.mulf %21, %23 : vector<128x128xf32>
    %c0_18 = arith.constant 0 : index
    %c0_19 = arith.constant 0 : index
    %25 = vector.load %arg9[%c0_18, %c0_19] : memref<1x128xf32, #tpu.memory_space<vmem>>, vector<1x128xf32>
    %26 = vector.broadcast %25 : vector<1x128xf32> to vector<128x128xf32>
    %27 = arith.addf %24, %26 : vector<128x128xf32>
    %cst_20 = arith.constant 0.000000e+00 : f32
    %28 = vector.broadcast %cst_20 : f32 to vector<128x128xf32>
    %29 = arith.cmpf oge, %27, %28 : vector<128x128xf32>
    %cst_21 = arith.constant 1.000000e-01 : f32
    %30 = vector.broadcast %cst_21 : f32 to vector<128x128xf32>
    %31 = arith.mulf %30, %27 : vector<128x128xf32>
    %32 = arith.select %29, %27, %31 : vector<128x128xi1>, vector<128x128xf32>
    %33 = arith.truncf %32 : vector<128x128xf32> to vector<128x128xbf16>
    %c0_22 = arith.constant 0 : index
    %c0_23 = arith.constant 0 : index
    %34 = vector.load %arg3[%c0_22, %c0_23] : memref<8x128xbf16, #tpu.memory_space<vmem>>, vector<8x128xbf16>
    %cst_24 = arith.constant dense<0.000000e+00> : vector<8x128xf32>
    %35 = tpu.matmul %34, %33, %cst_24 {dimension_numbers = #tpu.dot_dimension_numbers<[1], [0], [0], [1], [0, 0, 1, 1], [], []>} : vector<8x128xbf16>, vector<128x128xbf16>, vector<8x128xf32> -> vector<8x128xf32>
    %36 = arith.truncf %35 : vector<8x128xf32> to vector<8x128xbf16>
    %c0_25 = arith.constant 0 : index
    %c0_26 = arith.constant 0 : index
    %37 = vector.load %arg10[%c0_25, %c0_26] : memref<128x128xbf16, #tpu.memory_space<vmem>>, vector<128x128xbf16>
    %cst_27 = arith.constant dense<0.000000e+00> : vector<8x128xf32>
    %38 = tpu.matmul %36, %37, %cst_27 {dimension_numbers = #tpu.dot_dimension_numbers<[1], [0], [0], [1], [0, 0, 1, 1], [], []>} : vector<8x128xbf16>, vector<128x128xbf16>, vector<8x128xf32> -> vector<8x128xf32>
    %c0_28 = arith.constant 0 : index
    %c0_29 = arith.constant 0 : index
    %39 = vector.load %arg11[%c0_28, %c0_29] : memref<1x128xf32, #tpu.memory_space<vmem>>, vector<1x128xf32>
    %40 = vector.broadcast %39 : vector<1x128xf32> to vector<8x128xf32>
    %41 = arith.addf %38, %40 : vector<8x128xf32>
    %c0_30 = arith.constant 0 : index
    %c0_31 = arith.constant 0 : index
    %42 = vector.load %arg12[%c0_30, %c0_31] : memref<8x128xf32, #tpu.memory_space<vmem>>, vector<8x128xf32>
    tpu.vector_store %arg12[%c0_30, %c0_31], %41 {strides = array<i32>} : memref<8x128xf32, #tpu.memory_space<vmem>>, vector<8x128xf32>,
    return
  }
  func.func @transform_0(%arg0: i32) -> (i32, i32) {
    %c0_i32 = arith.constant 0 : i32
    %c0_i32_0 = arith.constant 0 : i32
    %c0_i32_1 = arith.constant 0 : i32
    return %c0_i32, %c0_i32_0 : i32, i32
  }
  func.func @transform_1(%arg0: i32) -> (i32, i32) {
    %c0_i32 = arith.constant 0 : i32
    %c0_i32_0 = arith.constant 0 : i32
    %c0_i32_1 = arith.constant 0 : i32
    return %c0_i32, %c0_i32_0 : i32, i32
  }
  func.func @transform_2(%arg0: i32) -> (i32, i32) {
    %c0_i32 = arith.constant 0 : i32
    %c0_i32_0 = arith.constant 0 : i32
    %c0_i32_1 = arith.constant 0 : i32
    return %c0_i32, %c0_i32_0 : i32, i32
  }
  func.func @transform_3(%arg0: i32) -> (i32, i32) {
    %c0_i32 = arith.constant 0 : i32
    %c0_i32_0 = arith.constant 0 : i32
    %c0_i32_1 = arith.constant 0 : i32
    return %c0_i32, %c0_i32_0 : i32, i32
  }
  func.func @transform_4(%arg0: i32) -> (i32, i32) {
    %c0_i32 = arith.constant 0 : i32
    %c0_i32_0 = arith.constant 0 : i32
    %c0_i32_1 = arith.constant 0 : i32
    return %c0_i32, %c0_i32_0 : i32, i32
  }
  func.func @transform_5(%arg0: i32) -> (i32, i32) {
    %c0_i32 = arith.constant 0 : i32
    %c0_i32_0 = arith.constant 0 : i32
    %c0_i32_1 = arith.constant 0 : i32
    return %c0_i32, %c0_i32_0 : i32, i32
  }
  func.func @transform_6(%arg0: i32) -> (i32, i32) {
    %c0_i32 = arith.constant 0 : i32
    %c0_i32_0 = arith.constant 0 : i32
    %c0_i32_1 = arith.constant 0 : i32
    return %c0_i32, %c0_i32_0 : i32, i32
  }
  func.func @transform_7(%arg0: i32) -> (i32, i32) {
    %c0_i32 = arith.constant 0 : i32
    %c0_i32_0 = arith.constant 0 : i32
    %c0_i32_1 = arith.constant 0 : i32
    return %c0_i32, %c0_i32_0 : i32, i32
  }
  func.func @transform_8(%arg0: i32) -> (i32, i32) {
    %c0_i32 = arith.constant 0 : i32
    %c0_i32_0 = arith.constant 0 : i32
    %c0_i32_1 = arith.constant 0 : i32
    return %c0_i32, %c0_i32_0 : i32, i32
  }
  func.func @transform_9(%arg0: i32) -> (i32, i32) {
    %c0_i32 = arith.constant 0 : i32
    %c0_i32_0 = arith.constant 0 : i32
    %c0_i32_1 = arith.constant 0 : i32
    return %c0_i32, %c0_i32_0 : i32, i32
  }
  func.func @transform_10(%arg0: i32) -> (i32, i32) {
    %c0_i32 = arith.constant 0 : i32
    %c0_i32_0 = arith.constant 0 : i32
    %c0_i32_1 = arith.constant 0 : i32
    return %c0_i32, %c0_i32_0 : i32, i32
  }
  func.func @transform_11(%arg0: i32) -> (i32, i32) {
    %c0_i32 = arith.constant 0 : i32
    %c0_i32_0 = arith.constant 0 : i32
    %c0_i32_1 = arith.constant 0 : i32
    return %c0_i32, %c0_i32_0 : i32, i32
  }
}

</mosaic_0001>

<bundles_post_ra>
// kernel: tpu_custom_call.1
= control target key start
LH: loop header
LB: loop body
LE: loop exit
PB: predicated region body
PF: predicated region fallthrough
CT: control target
= control target key end

     0   :  { %16 = vsyncpa [#allocation3], 0  ;;  %s1560_s0 = inlined_call_operand.hbm [shape: bf16[128,128], index: 0, kind: input, shape index: {}]   ;;  %s1561_s1 = inlined_call_operand.hbm [shape: bf16[128,128], index: 1, kind: input, shape index: {}]   ;;  %s1562_s2 = inlined_call_operand.hbm [shape: bf16[8,128], index: 2, kind: input, shape index: {}]   ;;  %s1563_s3 = inlined_call_operand.hbm [shape: bf16[128,128], index: 3, kind: input, shape index: {}]   ;;  %s1564_s4 = inlined_call_operand.vmem [shape: f32[1,128], index: 4, kind: input, shape index: {}]   ;;  %s1565_s5 = inlined_call_operand.vmem [shape: f32[1,128], index: 5, kind: input, shape index: {}]   ;;  %s1566_s6 = inlined_call_operand.hbm [shape: bf16[128,128], index: 6, kind: input, shape index: {}]   ;;  %s1567_s7 = inlined_call_operand.vmem [shape: f32[1,128], index: 7, kind: input, shape index: {}]   ;;  %s1568_s8 = inlined_call_operand.vmem [shape: f32[1,128], index: 8, kind: input, shape index: {}]   ;;  %s1569_s9 = inlined_call_operand.hbm [shape: bf16[128,128], index: 9, kind: input, shape index: {}]   ;;  %s1570_s10 = inlined_call_operand.vmem [shape: f32[1,128], index: 10, kind: input, shape index: {}]   ;;  %s1571_s11 = inlined_call_operand.hbm [shape: f32[8,128], index: 11, kind: output, shape index: {}]  }
   0x1   :  { %17 = vsyncpa [#allocation6], 0 }
   0x2   :  { %18 = vsyncpa [#allocation9], 0 }
   0x3   :  { %19 = vsyncpa [#allocation12], 0 }
   0x4   :  { %20 = vsyncpa [#allocation4], 0  ;;  %s38_s19 = sshll.u32 %s1561_s1, 4  ;;  %s1300_s20 = smov [#allocation5]   ;;  %s39_s19 = int_to_ptr.hbm [resolvable:$true] %s38_s19 }
   0x5   :  { %s40_s21 = sshll.u32 %s1300_s20, 4  ;;  %s62_s24 = sshll.u32 %s1563_s3, 4  ;;  %s41_s21 = int_to_ptr.vmem [resolvable:$true] %s40_s21  ;;  %s63_s24 = int_to_ptr.hbm [resolvable:$true] %s62_s24 }
   0x6   :  { %s1301_s25 = smov 64   ;;  %s1302_s26 = smov 4  }
   0x7   :  { %46 = dma.hbm_to_vmem [thread:$0]  %s39_s19, 1024, %s41_s21, [#allocation6], %s1301_s25, %s1301_s25, %s1302_s26  }
   0x8   :  { %s1303_s27 = smov [#allocation8]   ;;  %s25_s1 = sshll.u32 %s1560_s0, 4  ;;  %s26_s1 = int_to_ptr.hbm [resolvable:$true] %s25_s1 }
   0x9   :  { %s64_s28 = sshll.u32 %s1303_s27, 4  ;;  %s52_s13 = sshll.u32 %s1562_s2, 4  ;;  %s65_s28 = int_to_ptr.vmem [resolvable:$true] %s64_s28  ;;  %s53_s13 = int_to_ptr.hbm [resolvable:$true] %s52_s13 }
   0xa   :  { %70 = dma.hbm_to_vmem [thread:$0]  %s63_s24, 1024, %s65_s28, [#allocation9], %s1301_s25, %s1301_s25, %s1302_s26  }
   0xb   :  { %s1304_s14 = smov [#allocation2]   ;;  %s1305_s16 = smov [#allocation7]  }
   0xc   :  { %s27_s15 = sshll.u32 %s1304_s14, 4  ;;  %s54_s0 = sshll.u32 %s1305_s16, 4  ;;  %s28_s15 = int_to_ptr.vmem [resolvable:$true] %s27_s15  ;;  %s55_s0 = int_to_ptr.vmem [resolvable:$true] %s54_s0 }
   0xd   :  { %33 = dma.hbm_to_vmem [thread:$0]  %s26_s1, 1024, %s28_s15, [#allocation3], %s1301_s25, %s1301_s25, %s1302_s26  }
   0xe   :  { %s79_s19 = sshll.u32 %s1566_s6, 4  ;;  %s96_s2 = sshll.u32 %s1569_s9, 4  ;;  %s80_s19 = int_to_ptr.hbm [resolvable:$true] %s79_s19  ;;  %s97_s2 = int_to_ptr.hbm [resolvable:$true] %s96_s2 }
   0xf   :  { %57 = dma.hbm_to_vmem [thread:$0]  %s53_s13, 64, %s55_s0, [#allocation6]  }
  0x10   :  { %s1306_s22 = smov [#allocation10]   ;;  %s1307_s24 = smov [#allocation11]  }
  0x11   :  { %s81_s23 = sshll.u32 %s1306_s22, 4  ;;  %s98_s27 = sshll.u32 %s1307_s24, 4  ;;  %s82_s23 = int_to_ptr.vmem [resolvable:$true] %s81_s23  ;;  %s99_s27 = int_to_ptr.vmem [resolvable:$true] %s98_s27 }
  0x12   :  { %87 = dma.hbm_to_vmem [thread:$0]  %s80_s19, 1024, %s82_s23, [#allocation9], %s1301_s25, %s1301_s25, %s1302_s26  }
  0x13   :  { %104 = dma.hbm_to_vmem [thread:$0]  %s97_s2, 1024, %s99_s27, [#allocation12], %s1301_s25, %s1301_s25, %s1302_s26  }
  0x14   :  { %1290 = dma.done.wait [#allocation3], 1024  }
  0x15   :  { %1291 = vsyncadd [#allocation3], 4294966272 }
  0x16   :  { %1292 = dma.done.wait [#allocation6], 1088  }
  0x17   :  { %1293 = vsyncadd [#allocation6], 4294966208 }
  0x18   :  { %1294 = dma.done.wait [#allocation9], 2048  }
  0x19   :  { %1295 = vsyncadd [#allocation9], 4294965248 }
  0x1a   :  { %1296 = dma.done.wait [#allocation12], 1024  }
  0x1b   :  { %1297 = vsyncadd [#allocation12], 4294966272  ;;  %v1091_v0 = vld [vmem:[#allocation8 + $0x38] sm:$0xff]  ;;  %v1090_v1 = vld [vmem:[#allocation8 + $0x30] sm:$0xff]  ;;  %s1308_s30 = smov [#allocation13]   ;;  %s895_s13 = sshll.u32 %s1571_s11, 4  ;;  %s896_s13 = int_to_ptr.hbm [resolvable:$true] %s895_s13 }
  0x1c   :  { %275 = vmatpush.bf16.msra.mxu0 %v1091_v0  ;;  %v1089_v2 = vld [vmem:[#allocation8 + $0x28] sm:$0xff]  ;;  %v1088_v3 = vld [vmem:[#allocation8 + $0x20] sm:$0xff]  ;;  %v1087_v4 = vld [vmem:[#allocation8 + $0x18] sm:$0xff]  ;;  %s893_s1 = sshll.u32 %s1308_s30, 4  ;;  %s894_s1 = int_to_ptr.vmem [resolvable:$true] %s893_s1 }
  0x1d   :  { %v1086_v5 = vld [vmem:[#allocation8 + $0x10] sm:$0xff]  ;;  %v1085_v6 = vld [vmem:[#allocation8 + $0x8] sm:$0xff]  ;;  %v1084_v7 = vld [vmem:[#allocation8] sm:$0xff] }
  0x1e   :  { %v1076_v8 = vld [vmem:[#allocation2] sm:$0xff]  ;;  %v1077_v9 = vld [vmem:[#allocation2 + $0x8] sm:$0xff]  ;;  %v1078_v10 = vld [vmem:[#allocation2 + $0x10] sm:$0xff] }
  0x1f   :  { %v1079_v11 = vld [vmem:[#allocation2 + $0x18] sm:$0xff]  ;;  %v1080_v12 = vld [vmem:[#allocation2 + $0x20] sm:$0xff]  ;;  %v1081_v13 = vld [vmem:[#allocation2 + $0x28] sm:$0xff] }
  0x20   :  { %276 = vmatpush.bf16.msra.mxu0 %v1090_v1  ;;  %v1082_v14 = vld [vmem:[#allocation2 + $0x30] sm:$0xff]  ;;  %v1083_v15 = vld [vmem:[#allocation2 + $0x38] sm:$0xff]  ;;  %v1402_v40 = vld [vmem:[#allocation5] sm:$0xff] }
  0x21   :  { %v1405_v41 = vld [vmem:[#allocation5 + $0x8] sm:$0xff]  ;;  %v1408_v42 = vld [vmem:[#allocation5 + $0x10] sm:$0xff]  ;;  %v1411_v43 = vld [vmem:[#allocation5 + $0x18] sm:$0xff] }
  0x22   :  { %v1414_v44 = vld [vmem:[#allocation5 + $0x20] sm:$0xff]  ;;  %v1417_v45 = vld [vmem:[#allocation5 + $0x28] sm:$0xff]  ;;  %v1098_v47 = vld [vmem:[#allocation10 + $0x30] sm:$0xff] }
  0x23   :  { %v1099_v46 = vld [vmem:[#allocation10 + $0x38] sm:$0xff]  ;;  %v1097_v48 = vld [vmem:[#allocation10 + $0x28] sm:$0xff]  ;;  %v1096_v49 = vld [vmem:[#allocation10 + $0x20] sm:$0xff] }
  0x24   :  { %277 = vmatpush.bf16.msra.mxu0 %v1089_v2  ;;  %589 = vmatpush.bf16.msra.mxu2 %v1099_v46  ;;  %v1420_v50 = vld [vmem:[#allocation5 + $0x30] sm:$0xff]  ;;  %v1095_v51 = vld [vmem:[#allocation10 + $0x18] sm:$0xff]  ;;  %v1092_v54 = vld [vmem:[#allocation10] sm:$0xff] }
  0x25   :  { %v1094_v52 = vld [vmem:[#allocation10 + $0x10] sm:$0xff]  ;;  %v1093_v53 = vld [vmem:[#allocation10 + $0x8] sm:$0xff]  ;;  %v1429_v56 = vld [vmem:[%s1564_s4] ss:$0 sm:$0xff] }
  0x26   :  { %v1423_v55 = vld [vmem:[#allocation5 + $0x38] sm:$0xff]  ;;  %v1435_v59 = vld [vmem:[%s1565_s5] ss:$0 sm:$0xff] }
  0x28   :  { %278 = vmatpush.bf16.msra.mxu0 %v1088_v3  ;;  %590 = vmatpush.bf16.msra.mxu2 %v1098_v47 }
  0x2c   :  { %279 = vmatpush.bf16.msra.mxu0 %v1087_v4  ;;  %591 = vmatpush.bf16.msra.mxu2 %v1097_v48 }
  0x30   :  { %280 = vmatpush.bf16.msra.mxu0 %v1086_v5  ;;  %592 = vmatpush.bf16.msra.mxu2 %v1096_v49 }
  0x34   :  { %281 = vmatpush.bf16.msra.mxu0 %v1085_v6  ;;  %593 = vmatpush.bf16.msra.mxu2 %v1095_v51 }
  0x38   :  { %282 = vmatpush.bf16.msra.mxu0 %v1084_v7  ;;  %594 = vmatpush.bf16.msra.mxu2 %v1094_v52 }
  0x3b   :  { %283 = vmatmul.bf16.vlgmr.msra.gmra.mxu0 %v1076_v8 }
  0x3c   :  { %595 = vmatpush.bf16.msra.mxu2 %v1093_v53 }
  0x40   :  { %596 = vmatpush.bf16.msra.mxu2 %v1092_v54 }
  0x4b   :  { %288 = vmatmul.bf16.gmra.mxu0 %v1077_v9 }
  0x5b   :  { %293 = vmatmul.bf16.gmra.mxu0 %v1078_v10 }
  0x6b   :  { %298 = vmatmul.bf16.gmra.mxu0 %v1079_v11 }
  0x7b   :  { %303 = vmatmul.bf16.gmra.mxu0 %v1080_v12 }
  0x8b   :  { %308 = vmatmul.bf16.gmra.mxu0 %v1081_v13 }
  0x9b   :  { %313 = vmatmul.bf16.gmra.mxu0 %v1082_v14 }
  0xab   :  { %318 = vmatmul.bf16.gmra.mxu0 %v1083_v15 }
  0xb8   :  { %v284_v16 = vpop.f32.mrf.mxu0 }
  0xc0   :  { %v286_v17 = vpop.f32.mrf.mxu0 }
  0xc1   :  { %v324_v18 = vpack.c.bf16 %v286_v17, %v284_v16 }
  0xc8   :  { %v289_v19 = vpop.f32.mrf.mxu0 }
  0xd0   :  { %v291_v20 = vpop.f32.mrf.mxu0 }
  0xd1   :  { %v325_v21 = vpack.c.bf16 %v291_v20, %v289_v19 }
  0xd8   :  { %v294_v22 = vpop.f32.mrf.mxu0 }
  0xe0   :  { %v296_v23 = vpop.f32.mrf.mxu0 }
  0xe1   :  { %v326_v24 = vpack.c.bf16 %v296_v23, %v294_v22 }
  0xe8   :  { %v299_v25 = vpop.f32.mrf.mxu0 }
  0xf0   :  { %v301_v26 = vpop.f32.mrf.mxu0 }
  0xf1   :  { %v327_v27 = vpack.c.bf16 %v301_v26, %v299_v25 }
  0xf8   :  { %v304_v28 = vpop.f32.mrf.mxu0 }
 0x100   :  { %v306_v29 = vpop.f32.mrf.mxu0 }
 0x101   :  { %v328_v39 = vpack.c.bf16 %v306_v29, %v304_v28 }
 0x108   :  { %v309_v30 = vpop.f32.mrf.mxu0 }
 0x110   :  { %v311_v31 = vpop.f32.mrf.mxu0 }
 0x111   :  { %v329_v38 = vpack.c.bf16 %v311_v31, %v309_v30 }
 0x118   :  { %v314_v32 = vpop.f32.mrf.mxu0 }
 0x120   :  { %v316_v33 = vpop.f32.mrf.mxu0 }
 0x121   :  { %v330_v37 = vpack.c.bf16 %v316_v33, %v314_v32 }
 0x128   :  { %v319_v34 = vpop.f32.mrf.mxu0 }
 0x130   :  { %v321_v35 = vpop.f32.mrf.mxu0 }
 0x131   :  { %v331_v36 = vpack.c.bf16 %v321_v35, %v319_v34 }
 0x133   :  { %380 = vmatpush.bf16.msra.mxu1 %v331_v36 }
 0x137   :  { %381 = vmatpush.bf16.msra.mxu1 %v330_v37 }
 0x13b   :  { %382 = vmatpush.bf16.msra.mxu1 %v329_v38 }
 0x13f   :  { %383 = vmatpush.bf16.msra.mxu1 %v328_v39 }
 0x143   :  { %384 = vmatpush.bf16.msra.mxu1 %v327_v27 }
 0x147   :  { %385 = vmatpush.bf16.msra.mxu1 %v326_v24 }
 0x14b   :  { %386 = vmatpush.bf16.msra.mxu1 %v325_v21 }
 0x14f   :  { %387 = vmatpush.bf16.msra.mxu1 %v324_v18 }
 0x152   :  { %388 = vmatmul.bf16.vlgmr.msra.gmra.mxu1 %v1402_v40 }
 0x162   :  { %393 = vmatmul.bf16.gmra.mxu1 %v1405_v41 }
 0x172   :  { %398 = vmatmul.bf16.gmra.mxu1 %v1408_v42 }
 0x182   :  { %403 = vmatmul.bf16.gmra.mxu1 %v1411_v43 }
 0x192   :  { %408 = vmatmul.bf16.gmra.mxu1 %v1414_v44 }
 0x1a2   :  { %413 = vmatmul.bf16.gmra.mxu1 %v1417_v45 }
 0x1b2   :  { %418 = vmatmul.bf16.gmra.mxu1 %v1420_v50 }
 0x1c2   :  { %423 = vmatmul.bf16.gmra.mxu1 %v1423_v55 }
 0x1cf   :  { %v389_v57 = vpop.f32.mrf.mxu1 }
 0x1d0   :  { %v433_v58 = vmul.f32 %v1429_v56, %v389_v57 }
 0x1d2   :  { %v453_v60 = vadd.f32 %v1435_v59, %v433_v58 }
 0x1d4   :  { %v485_v0 = vmul.f32 0.1, %v453_v60  ;;  %vm469_vm0 = vcmp.ge.f32.partialorder %v453_v60, 0.0 }
 0x1d6   :  { %v501_v2 = vsel %vm469_vm0, %v453_v60, %v485_v0 }
 0x1d7   :  { %v391_v61 = vpop.f32.mrf.mxu1 }
 0x1d8   :  { %v434_v62 = vmul.f32 %v1429_v56, %v391_v61 }
 0x1da   :  { %v454_v63 = vadd.f32 %v1435_v59, %v434_v62 }
 0x1dc   :  { %vm470_vm1 = vcmp.ge.f32.partialorder %v454_v63, 0.0  ;;  %v486_v1 = vmul.f32 0.1, %v454_v63 }
 0x1de   :  { %v502_v3 = vsel %vm470_vm1, %v454_v63, %v486_v1 }
 0x1df   :  { %v394_v4 = vpop.f32.mrf.mxu1  ;;  %v517_v5 = vpack.c.bf16 %v502_v3, %v501_v2 }
 0x1e0   :  { %v435_v6 = vmul.f32 %v1429_v56, %v394_v4 }
 0x1e1   :  { %597 = vmatmul.bf16.vlgmr.msra.gmra.mxu2 %v517_v5 }
 0x1e2   :  { %v455_v7 = vadd.f32 %v1435_v59, %v435_v6 }
 0x1e4   :  { %v487_v11 = vmul.f32 0.1, %v455_v7  ;;  %vm471_vm2 = vcmp.ge.f32.partialorder %v455_v7, 0.0 }
 0x1e6   :  { %v503_v13 = vsel %vm471_vm2, %v455_v7, %v487_v11 }
 0x1e7   :  { %v396_v8 = vpop.f32.mrf.mxu1 }
 0x1e8   :  { %v436_v9 = vmul.f32 %v1429_v56, %v396_v8 }
 0x1ea   :  { %v456_v10 = vadd.f32 %v1435_v59, %v436_v9 }
 0x1ec   :  { %vm472_vm3 = vcmp.ge.f32.partialorder %v456_v10, 0.0  ;;  %v488_v12 = vmul.f32 0.1, %v456_v10 }
 0x1ee   :  { %v504_v14 = vsel %vm472_vm3, %v456_v10, %v488_v12 }
 0x1ef   :  { %v399_v15 = vpop.f32.mrf.mxu1  ;;  %v518_v16 = vpack.c.bf16 %v504_v14, %v503_v13 }
 0x1f0   :  { %v437_v17 = vmul.f32 %v1429_v56, %v399_v15 }
 0x1f1   :  { %602 = vmatmul.bf16.gmra.mxu2 %v518_v16 }
 0x1f2   :  { %v457_v18 = vadd.f32 %v1435_v59, %v437_v17 }
 0x1f4   :  { %v489_v22 = vmul.f32 0.1, %v457_v18  ;;  %vm473_vm4 = vcmp.ge.f32.partialorder %v457_v18, 0.0 }
 0x1f6   :  { %v505_v24 = vsel %vm473_vm4, %v457_v18, %v489_v22 }
 0x1f7   :  { %v401_v19 = vpop.f32.mrf.mxu1 }
 0x1f8   :  { %v438_v20 = vmul.f32 %v1429_v56, %v401_v19 }
 0x1fa   :  { %v458_v21 = vadd.f32 %v1435_v59, %v438_v20 }
 0x1fc   :  { %vm474_vm5 = vcmp.ge.f32.partialorder %v458_v21, 0.0  ;;  %v490_v23 = vmul.f32 0.1, %v458_v21 }
 0x1fe   :  { %v506_v25 = vsel %vm474_vm5, %v458_v21, %v490_v23 }
 0x1ff   :  { %v404_v26 = vpop.f32.mrf.mxu1  ;;  %v519_v27 = vpack.c.bf16 %v506_v25, %v505_v24 }
 0x200   :  { %v439_v28 = vmul.f32 %v1429_v56, %v404_v26 }
 0x201   :  { %607 = vmatmul.bf16.gmra.mxu2 %v519_v27 }
 0x202   :  { %v459_v29 = vadd.f32 %v1435_v59, %v439_v28 }
 0x204   :  { %v491_v33 = vmul.f32 0.1, %v459_v29  ;;  %vm475_vm6 = vcmp.ge.f32.partialorder %v459_v29, 0.0 }
 0x206   :  { %v507_v35 = vsel %vm475_vm6, %v459_v29, %v491_v33 }
 0x207   :  { %v406_v30 = vpop.f32.mrf.mxu1 }
 0x208   :  { %v440_v31 = vmul.f32 %v1429_v56, %v406_v30 }
 0x20a   :  { %v460_v32 = vadd.f32 %v1435_v59, %v440_v31 }
 0x20c   :  { %vm476_vm7 = vcmp.ge.f32.partialorder %v460_v32, 0.0  ;;  %v492_v34 = vmul.f32 0.1, %v460_v32 }
 0x20e   :  { %v508_v36 = vsel %vm476_vm7, %v460_v32, %v492_v34 }
 0x20f   :  { %v409_v37 = vpop.f32.mrf.mxu1  ;;  %v520_v38 = vpack.c.bf16 %v508_v36, %v507_v35 }
 0x210   :  { %v441_v39 = vmul.f32 %v1429_v56, %v409_v37 }
 0x211   :  { %612 = vmatmul.bf16.gmra.mxu2 %v520_v38 }
 0x212   :  { %v461_v46 = vadd.f32 %v1435_v59, %v441_v39 }
 0x214   :  { %v493_v51 = vmul.f32 0.1, %v461_v46  ;;  %vm477_vm8 = vcmp.ge.f32.partialorder %v461_v46, 0.0 }
 0x216   :  { %v509_v53 = vsel %vm477_vm8, %v461_v46, %v493_v51 }
 0x217   :  { %v411_v47 = vpop.f32.mrf.mxu1 }
 0x218   :  { %v442_v48 = vmul.f32 %v1429_v56, %v411_v47 }
 0x21a   :  { %v462_v49 = vadd.f32 %v1435_v59, %v442_v48 }
 0x21c   :  { %vm478_vm9 = vcmp.ge.f32.partialorder %v462_v49, 0.0  ;;  %v494_v52 = vmul.f32 0.1, %v462_v49 }
 0x21e   :  { %v510_v54 = vsel %vm478_vm9, %v462_v49, %v494_v52 }
 0x21f   :  { %v414_v57 = vpop.f32.mrf.mxu1  ;;  %v521_v58 = vpack.c.bf16 %v510_v54, %v509_v53 }
 0x220   :  { %v443_v60 = vmul.f32 %v1429_v56, %v414_v57 }
 0x221   :  { %617 = vmatmul.bf16.gmra.mxu2 %v521_v58 }
 0x222   :  { %v463_v61 = vadd.f32 %v1435_v59, %v443_v60  ;;  %v1479_v60 = vld [vmem:[%s1567_s7] ss:$0 sm:$0xff] }
 0x224   :  { %v495_v1 = vmul.f32 0.1, %v463_v61  ;;  %vm479_vm10 = vcmp.ge.f32.partialorder %v463_v61, 0.0 }
 0x226   :  { %v511_v3 = vsel %vm479_vm10, %v463_v61, %v495_v1 }
 0x227   :  { %v416_v62 = vpop.f32.mrf.mxu1 }
 0x228   :  { %v444_v63 = vmul.f32 %v1429_v56, %v416_v62 }
 0x22a   :  { %v464_v0 = vadd.f32 %v1435_v59, %v444_v63 }
 0x22c   :  { %vm480_vm11 = vcmp.ge.f32.partialorder %v464_v0, 0.0  ;;  %v496_v2 = vmul.f32 0.1, %v464_v0 }
 0x22e   :  { %v512_v4 = vsel %vm480_vm11, %v464_v0, %v496_v2 }
 0x22f   :  { %v419_v5 = vpop.f32.mrf.mxu1  ;;  %v522_v6 = vpack.c.bf16 %v512_v4, %v511_v3 }
 0x230   :  { %v445_v7 = vmul.f32 %v1429_v56, %v419_v5 }
 0x231   :  { %622 = vmatmul.bf16.gmra.mxu2 %v522_v6 }
 0x232   :  { %v465_v8 = vadd.f32 %v1435_v59, %v445_v7 }
 0x234   :  { %v497_v12 = vmul.f32 0.1, %v465_v8  ;;  %vm481_vm12 = vcmp.ge.f32.partialorder %v465_v8, 0.0 }
 0x236   :  { %v513_v14 = vsel %vm481_vm12, %v465_v8, %v497_v12 }
 0x237   :  { %v421_v9 = vpop.f32.mrf.mxu1 }
 0x238   :  { %v446_v10 = vmul.f32 %v1429_v56, %v421_v9 }
 0x23a   :  { %v466_v11 = vadd.f32 %v1435_v59, %v446_v10 }
 0x23c   :  { %vm482_vm13 = vcmp.ge.f32.partialorder %v466_v11, 0.0  ;;  %v498_v13 = vmul.f32 0.1, %v466_v11 }
 0x23e   :  { %v514_v15 = vsel %vm482_vm13, %v466_v11, %v498_v13 }
 0x23f   :  { %v424_v16 = vpop.f32.mrf.mxu1  ;;  %v523_v17 = vpack.c.bf16 %v514_v15, %v513_v14 }
 0x240   :  { %v447_v18 = vmul.f32 %v1429_v56, %v424_v16 }
 0x241   :  { %627 = vmatmul.bf16.gmra.mxu2 %v523_v17 }
 0x242   :  { %v467_v19 = vadd.f32 %v1435_v59, %v447_v18 }
 0x244   :  { %v499_v23 = vmul.f32 0.1, %v467_v19  ;;  %vm483_vm14 = vcmp.ge.f32.partialorder %v467_v19, 0.0 }
 0x246   :  { %v515_v25 = vsel %vm483_vm14, %v467_v19, %v499_v23 }
 0x247   :  { %v426_v20 = vpop.f32.mrf.mxu1 }
 0x248   :  { %v448_v21 = vmul.f32 %v1429_v56, %v426_v20 }
 0x24a   :  { %v468_v22 = vadd.f32 %v1435_v59, %v448_v21 }
 0x24c   :  { %vm484_vm15 = vcmp.ge.f32.partialorder %v468_v22, 0.0  ;;  %v500_v24 = vmul.f32 0.1, %v468_v22 }
 0x24e   :  { %v516_v26 = vsel %vm484_vm15, %v468_v22, %v500_v24 }
 0x24f   :  { %v524_v27 = vpack.c.bf16 %v516_v26, %v515_v25 }
 0x251   :  { %632 = vmatmul.bf16.gmra.mxu2 %v524_v27 }
 0x264   :  { %v598_v28 = vpop.f32.mrf.mxu2 }
 0x26c   :  { %v600_v29 = vpop.f32.mrf.mxu2 }
 0x26d   :  { %v638_v30 = vpack.c.bf16 %v600_v29, %v598_v28 }
 0x274   :  { %v603_v31 = vpop.f32.mrf.mxu2 }
 0x27c   :  { %v605_v32 = vpop.f32.mrf.mxu2 }
 0x27d   :  { %v639_v33 = vpack.c.bf16 %v605_v32, %v603_v31 }
 0x284   :  { %v608_v34 = vpop.f32.mrf.mxu2 }
 0x28c   :  { %v610_v35 = vpop.f32.mrf.mxu2 }
 0x28d   :  { %v640_v36 = vpack.c.bf16 %v610_v35, %v608_v34 }
 0x294   :  { %v613_v56 = vpop.f32.mrf.mxu2 }
 0x29c   :  { %v615_v37 = vpop.f32.mrf.mxu2 }
 0x29d   :  { %v641_v59 = vpack.c.bf16 %v615_v37, %v613_v56 }
 0x2a4   :  { %v618_v38 = vpop.f32.mrf.mxu2 }
 0x2ac   :  { %v620_v39 = vpop.f32.mrf.mxu2 }
 0x2ad   :  { %v642_v58 = vpack.c.bf16 %v620_v39, %v618_v38 }
 0x2b4   :  { %v623_v46 = vpop.f32.mrf.mxu2 }
 0x2bc   :  { %v625_v47 = vpop.f32.mrf.mxu2 }
 0x2bd   :  { %v643_v57 = vpack.c.bf16 %v625_v47, %v623_v46 }
 0x2c4   :  { %v628_v48 = vpop.f32.mrf.mxu2 }
 0x2cc   :  { %v630_v49 = vpop.f32.mrf.mxu2 }
 0x2cd   :  { %v644_v54 = vpack.c.bf16 %v630_v49, %v628_v48 }
 0x2d4   :  { %v633_v51 = vpop.f32.mrf.mxu2 }
 0x2dc   :  { %v635_v52 = vpop.f32.mrf.mxu2 }
 0x2dd   :  { %v645_v53 = vpack.c.bf16 %v635_v52, %v633_v51 }
 0x2df   :  { %646 = vmatpush.bf16.msra.mxu3 %v645_v53 }
 0x2e3   :  { %647 = vmatpush.bf16.msra.mxu3 %v644_v54 }
 0x2e7   :  { %648 = vmatpush.bf16.msra.mxu3 %v643_v57 }
 0x2eb   :  { %649 = vmatpush.bf16.msra.mxu3 %v642_v58 }
 0x2ef   :  { %650 = vmatpush.bf16.msra.mxu3 %v641_v59 }
 0x2f3   :  { %651 = vmatpush.bf16.msra.mxu3 %v640_v36 }
 0x2f7   :  { %652 = vmatpush.bf16.msra.mxu3 %v639_v33 }
 0x2fb   :  { %653 = vmatpush.bf16.msra.mxu3 %v638_v30 }
 0x2fe   :  { %654 = vmatmul.bf16.vlgmr.msra.gmra.mxu3 %v1402_v40 }
 0x30e   :  { %659 = vmatmul.bf16.gmra.mxu3 %v1405_v41 }
 0x31e   :  { %664 = vmatmul.bf16.gmra.mxu3 %v1408_v42  ;;  %v1485_v42 = vld [vmem:[%s1568_s8] ss:$0 sm:$0xff] }
 0x32e   :  { %669 = vmatmul.bf16.gmra.mxu3 %v1411_v43 }
 0x33e   :  { %674 = vmatmul.bf16.gmra.mxu3 %v1414_v44 }
 0x34e   :  { %679 = vmatmul.bf16.gmra.mxu3 %v1417_v45 }
 0x35e   :  { %684 = vmatmul.bf16.gmra.mxu3 %v1420_v50 }
 0x36e   :  { %689 = vmatmul.bf16.gmra.mxu3 %v1423_v55 }
 0x381   :  { %v655_v40 = vpop.f32.mrf.mxu3 }
 0x382   :  { %v699_v41 = vmul.f32 %v1479_v60, %v655_v40 }
 0x384   :  { %v719_v43 = vadd.f32 %v1485_v42, %v699_v41 }
 0x386   :  { %v751_v55 = vmul.f32 0.1, %v719_v43  ;;  %vm735_vm0 = vcmp.ge.f32.partialorder %v719_v43, 0.0 }
 0x388   :  { %v1490_v62 = vsel %vm735_vm0, %v719_v43, %v751_v55 }
 0x389   :  { %v657_v44 = vpop.f32.mrf.mxu3 }
 0x38a   :  { %v700_v45 = vmul.f32 %v1479_v60, %v657_v44 }
 0x38c   :  { %v720_v50 = vadd.f32 %v1485_v42, %v700_v45 }
 0x38e   :  { %vm736_vm1 = vcmp.ge.f32.partialorder %v720_v50, 0.0  ;;  %v752_v61 = vmul.f32 0.1, %v720_v50 }
 0x390   :  { %v1492_v63 = vsel %vm736_vm1, %v720_v50, %v752_v61 }
 0x391   :  { %v660_v0 = vpop.f32.mrf.mxu3  ;;  %v783_v1 = vpack.c.bf16 %v1492_v63, %v1490_v62 }
 0x392   :  { %v701_v2 = vmul.f32 %v1479_v60, %v660_v0 }
 0x394   :  { %v721_v3 = vadd.f32 %v1485_v42, %v701_v2 }
 0x396   :  { %v753_v7 = vmul.f32 0.1, %v721_v3  ;;  %vm737_vm2 = vcmp.ge.f32.partialorder %v721_v3, 0.0 }
 0x398   :  { %v1500_v9 = vsel %vm737_vm2, %v721_v3, %v753_v7  ;;  %v1107_v7 = vld [vmem:[#allocation11 + $0x38] sm:$0xff] }
 0x399   :  { %v662_v4 = vpop.f32.mrf.mxu3  ;;  %874 = vmatpush.bf16.msrb.mxu1 %v1107_v7 }
 0x39a   :  { %v702_v5 = vmul.f32 %v1479_v60, %v662_v4 }
 0x39c   :  { %v722_v6 = vadd.f32 %v1485_v42, %v702_v5 }
 0x39e   :  { %vm738_vm3 = vcmp.ge.f32.partialorder %v722_v6, 0.0  ;;  %v754_v8 = vmul.f32 0.1, %v722_v6 }
 0x3a0   :  { %v1502_v10 = vsel %vm738_vm3, %v722_v6, %v754_v8 }
 0x3a1   :  { %v665_v11 = vpop.f32.mrf.mxu3  ;;  %v784_v12 = vpack.c.bf16 %v1502_v10, %v1500_v9 }
 0x3a2   :  { %v703_v13 = vmul.f32 %v1479_v60, %v665_v11 }
 0x3a4   :  { %v723_v14 = vadd.f32 %v1485_v42, %v703_v13 }
 0x3a6   :  { %v755_v18 = vmul.f32 0.1, %v723_v14  ;;  %vm739_vm4 = vcmp.ge.f32.partialorder %v723_v14, 0.0 }
 0x3a8   :  { %v1510_v20 = vsel %vm739_vm4, %v723_v14, %v755_v18 }
 0x3a9   :  { %v667_v15 = vpop.f32.mrf.mxu3 }
 0x3aa   :  { %v704_v16 = vmul.f32 %v1479_v60, %v667_v15 }
 0x3ac   :  { %v724_v17 = vadd.f32 %v1485_v42, %v704_v16 }
 0x3ae   :  { %vm740_vm5 = vcmp.ge.f32.partialorder %v724_v17, 0.0  ;;  %v756_v19 = vmul.f32 0.1, %v724_v17 }
 0x3b0   :  { %v1512_v21 = vsel %vm740_vm5, %v724_v17, %v756_v19  ;;  %v1105_v19 = vld [vmem:[#allocation11 + $0x28] sm:$0xff] }
 0x3b1   :  { %v670_v22 = vpop.f32.mrf.mxu3  ;;  %v785_v23 = vpack.c.bf16 %v1512_v21, %v1510_v20  ;;  %v1121_v21 = vld [vmem:[%s1570_s10] ss:$0 sm:$0xff] }
 0x3b2   :  { %v705_v24 = vmul.f32 %v1479_v60, %v670_v22 }
 0x3b4   :  { %v725_v25 = vadd.f32 %v1485_v42, %v705_v24 }
 0x3b6   :  { %v757_v29 = vmul.f32 0.1, %v725_v25  ;;  %vm741_vm6 = vcmp.ge.f32.partialorder %v725_v25, 0.0 }
 0x3b8   :  { %v1520_v31 = vsel %vm741_vm6, %v725_v25, %v757_v29  ;;  %v1101_v29 = vld [vmem:[#allocation11 + $0x8] sm:$0xff] }
 0x3b9   :  { %v672_v26 = vpop.f32.mrf.mxu3 }
 0x3ba   :  { %v706_v27 = vmul.f32 %v1479_v60, %v672_v26 }
 0x3bc   :  { %v726_v28 = vadd.f32 %v1485_v42, %v706_v27  ;;  %v1103_v27 = vld [vmem:[#allocation11 + $0x18] sm:$0xff] }
 0x3be   :  { %vm742_vm7 = vcmp.ge.f32.partialorder %v726_v28, 0.0  ;;  %v758_v30 = vmul.f32 0.1, %v726_v28 }
 0x3c0   :  { %v1522_v32 = vsel %vm742_vm7, %v726_v28, %v758_v30  ;;  %v1102_v28 = vld [vmem:[#allocation11 + $0x10] sm:$0xff]  ;;  %v1100_v30 = vld [vmem:[#allocation11] sm:$0xff] }
 0x3c1   :  { %v675_v33 = vpop.f32.mrf.mxu3  ;;  %v786_v34 = vpack.c.bf16 %v1522_v32, %v1520_v31  ;;  %v791_v31 = vld [vmem:[#allocation7] sm:$0xf] }
 0x3c2   :  { %v707_v50 = vmul.f32 %v1479_v60, %v675_v33 }
 0x3c4   :  { %v727_v8 = vadd.f32 %v1485_v42, %v707_v50 }
 0x3c6   :  { %v759_v18 = vmul.f32 0.1, %v727_v8  ;;  %vm743_vm15 = vcmp.ge.f32.partialorder %v727_v8, 0.0 }
 0x3c8   :  { %v775_v25 = vsel %vm743_vm15, %v727_v8, %v759_v18 }
 0x3c9   :  { %v677_v35 = vpop.f32.mrf.mxu3 }
 0x3ca   :  { %v708_v41 = vmul.f32 %v1479_v60, %v677_v35 }
 0x3cc   :  { %v728_v4 = vadd.f32 %v1485_v42, %v708_v41 }
 0x3ce   :  { %v760_v16 = vmul.f32 0.1, %v728_v4  ;;  %vm744_vm14 = vcmp.ge.f32.partialorder %v728_v4, 0.0 }
 0x3d0   :  { %v776_v24 = vsel %vm744_vm14, %v728_v4, %v760_v16 }
 0x3d1   :  { %v680_v36 = vpop.f32.mrf.mxu3  ;;  %v787_v26 = vpack.c.bf16 %v776_v24, %v775_v25 }
 0x3d2   :  { %v709_v54 = vmul.f32 %v1479_v60, %v680_v36 }
 0x3d4   :  { %v729_v55 = vadd.f32 %v1485_v42, %v709_v54 }
 0x3d6   :  { %v761_v13 = vmul.f32 0.1, %v729_v55  ;;  %vm745_vm13 = vcmp.ge.f32.partialorder %v729_v55, 0.0 }
 0x3d8   :  { %v777_v17 = vsel %vm745_vm13, %v729_v55, %v761_v13 }
 0x3d9   :  { %v682_v56 = vpop.f32.mrf.mxu3 }
 0x3da   :  { %v710_v51 = vmul.f32 %v1479_v60, %v682_v56 }
 0x3dc   :  { %v730_v43 = vadd.f32 %v1485_v42, %v710_v51 }
 0x3de   :  { %v762_v6 = vmul.f32 0.1, %v730_v43  ;;  %vm746_vm12 = vcmp.ge.f32.partialorder %v730_v43, 0.0 }
 0x3e0   :  { %v778_v15 = vsel %vm746_vm12, %v730_v43, %v762_v6 }
 0x3e1   :  { %v685_v37 = vpop.f32.mrf.mxu3  ;;  %v788_v22 = vpack.c.bf16 %v778_v15, %v777_v17 }
 0x3e2   :  { %v711_v47 = vmul.f32 %v1479_v60, %v685_v37 }
 0x3e4   :  { %v731_v57 = vadd.f32 %v1485_v42, %v711_v47 }
 0x3e6   :  { %v763_v2 = vmul.f32 0.1, %v731_v57  ;;  %vm747_vm11 = vcmp.ge.f32.partialorder %v731_v57, 0.0 }
 0x3e8   :  { %v779_v11 = vsel %vm747_vm11, %v731_v57, %v763_v2 }
 0x3e9   :  { %v687_v59 = vpop.f32.mrf.mxu3 }
 0x3ea   :  { %v712_v46 = vmul.f32 %v1479_v60, %v687_v59 }
 0x3ec   :  { %v732_v52 = vadd.f32 %v1485_v42, %v712_v46 }
 0x3ee   :  { %v764_v45 = vmul.f32 0.1, %v732_v52  ;;  %vm748_vm10 = vcmp.ge.f32.partialorder %v732_v52, 0.0 }
 0x3f0   :  { %v780_v5 = vsel %vm748_vm10, %v732_v52, %v764_v45 }
 0x3f1   :  { %v690_v38 = vpop.f32.mrf.mxu3  ;;  %v789_v14 = vpack.c.bf16 %v780_v5, %v779_v11 }
 0x3f2   :  { %v713_v39 = vmul.f32 %v1479_v60, %v690_v38 }
 0x3f4   :  { %v733_v48 = vadd.f32 %v1485_v42, %v713_v39 }
 0x3f6   :  { %v765_v40 = vmul.f32 0.1, %v733_v48  ;;  %vm749_vm8 = vcmp.ge.f32.partialorder %v733_v48, 0.0 }
 0x3f8   :  { %v781_v61 = vsel %vm749_vm8, %v733_v48, %v765_v40 }
 0x3f9   :  { %v692_v49 = vpop.f32.mrf.mxu3 }
 0x3fa   :  { %v714_v53 = vmul.f32 %v1479_v60, %v692_v49  ;;  %v1106_v60 = vld [vmem:[#allocation11 + $0x30] sm:$0xff] }
 0x3fb   :  { %875 = vmatpush.bf16.msrb.mxu1 %v1106_v60 }
 0x3fc   :  { %v734_v58 = vadd.f32 %v1485_v42, %v714_v53  ;;  %v1104_v42 = vld [vmem:[#allocation11 + $0x20] sm:$0xff] }
 0x3fe   :  { %vm750_vm9 = vcmp.ge.f32.partialorder %v734_v58, 0.0  ;;  %v766_v44 = vmul.f32 0.1, %v734_v58 }
 0x3ff   :  { %876 = vmatpush.bf16.msrb.mxu1 %v1105_v19 }
 0x400   :  { %v782_v0 = vsel %vm750_vm9, %v734_v58, %v766_v44 }
 0x401   :  { %v790_v3 = vpack.c.bf16 %v782_v0, %v781_v61 }
 0x403   :  { %792 = vmatpush.bf16.msrb.mxu0 %v790_v3  ;;  %877 = vmatpush.bf16.msrb.mxu1 %v1104_v42 }
 0x407   :  { %793 = vmatpush.bf16.msrb.mxu0 %v789_v14  ;;  %878 = vmatpush.bf16.msrb.mxu1 %v1103_v27 }
 0x40b   :  { %794 = vmatpush.bf16.msrb.mxu0 %v788_v22  ;;  %879 = vmatpush.bf16.msrb.mxu1 %v1102_v28 }
 0x40f   :  { %795 = vmatpush.bf16.msrb.mxu0 %v787_v26  ;;  %880 = vmatpush.bf16.msrb.mxu1 %v1101_v29 }
 0x413   :  { %796 = vmatpush.bf16.msrb.mxu0 %v786_v34  ;;  %881 = vmatpush.bf16.msrb.mxu1 %v1100_v30 }
 0x417   :  { %797 = vmatpush.bf16.msrb.mxu0 %v785_v23 }
 0x41b   :  { %798 = vmatpush.bf16.msrb.mxu0 %v784_v12 }
 0x41f   :  { %799 = vmatpush.bf16.msrb.mxu0 %v783_v1 }
 0x422   :  { %800 = vmatmul.bf16.vlgmr.msrb.gmra.mxu0 %v791_v31 }
 0x49f   :  { %v801_v32 = vpop.f32.mrf.mxu0 }
 0x4a0   :  { %v805_v33 = vpack.c.bf16 %v801_v32, %v801_v32 }
 0x4a2   :  { %882 = vmatmul.bf16.vlgmr.msrb.gmra.mxu1 %v805_v33 }
 0x4a7   :  { %v803_v20 = vpop.f32.mrf.mxu0 }
 0x51f   :  { %v883_v9 = vpop.f32.mrf.mxu1 }
 0x520   :  { %v884_v62 = vadd.f32 %v1121_v21, %v883_v9 }
 0x522   :  { %887 = vst [vmem:[#allocation13] sm:$0xff] %v884_v62 }
 0x523   :  { %898 = dma.vmem_to_hbm [thread:$0]  %s894_s1, 128, %s896_s13, [#allocation4]  }
 0x527   :  { %v885_v63 = vpop.f32.mrf.mxu1 }
 0x528   :  { %1298 = dma.done.wait [#allocation4], 128  }
 0x529   :  { %1299 = vsyncadd [#allocation4], 4294967168 }
 0x52a   :  { %903 = vsyncpa [#allocation3], 1 }
 0x52b   :  { %904 = vsyncpa [#allocation6], 1 }
 0x52c   :  { %905 = vsyncpa [#allocation9], 1 }
 0x52d   :  { %906 = vsyncpa [#allocation12], 1 }
 0x52e   :  { %907 = vsyncpa [#allocation4], 1 }

</bundles_post_ra>
